<compile_context>
chip_gen: v5e
topology: v5e:2x2
jax: 0.10.0
libtpu: 0.0.40
codegen_flags: <defaults>
</compile_context>

<pallas_src>
import math
from functools import partial

import jax
import jax.numpy as jnp
import numpy as np
from jax import lax
from jax.experimental import pallas as pl
from jax.experimental.pallas import tpu as pltpu


WEIGHT_ORDER = ("ln1_w", "ln1_b", "w_qkv", "b_qkv", "w_o", "b_o",
                "ln2_w", "ln2_b", "w_fc", "b_fc", "w_pr", "b_pr")
_NUM_WEIGHTS = len(WEIGHT_ORDER)


# ----------------------------------------------------------------------------
# Capability probe: single-buffered constant weight blocks (pl.Buffered(1)).
# Falls back to default double-buffering if unsupported on this JAX version.
# ----------------------------------------------------------------------------
_SINGLE_BUFFER_OK = None


def _single_buffer_supported():
    global _SINGLE_BUFFER_OK
    if _SINGLE_BUFFER_OK is None:
        try:
            w_spec = pl.BlockSpec((8, 128), lambda i: (0, 0),
                                  pipeline_mode=pl.Buffered(1))

            def _probe(w_ref, o_ref):
                o_ref[...] = w_ref[...] + 1.0

            out = pl.pallas_call(
                _probe,
                out_shape=jax.ShapeDtypeStruct((8, 128), jnp.float32),
                grid=(2,),
                in_specs=[w_spec],
                out_specs=pl.BlockSpec((8, 128), lambda i: (0, 0)),
            )(jnp.zeros((8, 128), jnp.float32))
            jax.block_until_ready(out)
            _SINGLE_BUFFER_OK = True
        except Exception:
            _SINGLE_BUFFER_OK = False
    return _SINGLE_BUFFER_OK


def _const_weight_spec(shape):
    """BlockSpec for a grid-invariant (weight) operand."""
    index_map = lambda b: (0,) * len(shape)
    if _single_buffer_supported():
        return pl.BlockSpec(shape, index_map, pipeline_mode=pl.Buffered(1))
    return pl.BlockSpec(shape, index_map)


def _vmem_limit_bytes():
    """Generation-aware VMEM limit: ~75% of physical, capped at 112 MiB."""
    cap = 64 * 1024 * 1024            # conservative fallback (v7x per-core VMEM)
    try:
        cap = int(pltpu.get_tpu_info().vmem_capacity_bytes)
    except Exception:
        pass
    return max(32 * 1024 * 1024, min((cap * 3) // 4, 112 * 1024 * 1024))


# ----------------------------------------------------------------------------
# Pallas kernel: one full residual attention block for a single batch element
# ----------------------------------------------------------------------------
def _resblock_kernel(*args, d_model, n_head, heads_per_group, mlp_chunk,
                     has_mask):
    x_ref = args[0]
    (ln1w_ref, ln1b_ref, wqkv_ref, bqkv_ref, wo_ref, bo_ref,
     ln2w_ref, ln2b_ref, wfc_ref, bfc_ref, wpr_ref, bpr_ref) = \
        args[1:1 + _NUM_WEIGHTS]
    pos = 1 + _NUM_WEIGHTS
    mask_ref = None
    if has_mask:
        mask_ref = args[pos]
        pos += 1
    o_ref = args[pos]
    attn_ref = args[pos + 1]                       # VMEM scratch (L, D) bf16

    L = x_ref.shape[0]
    D = d_model
    hd = D // n_head
    gw = heads_per_group * hd
    n_groups = n_head // heads_per_group
    eps = 1e-5
    bf16, f32 = jnp.bfloat16, jnp.float32

    def layer_norm(v, w, b):                       # v:(R,D) f32, w/b:(1,D) f32
        mu = jnp.mean(v, axis=-1, keepdims=True)
        c = v - mu
        var = jnp.mean(c * c, axis=-1, keepdims=True)
        return c * lax.rsqrt(var + eps) * w + b

    # ---- self-attention branch ---------------------------------------------
    h1 = layer_norm(x_ref[...], ln1w_ref[...], ln1b_ref[...])
    qkv = jnp.dot(h1.astype(bf16), wqkv_ref[...],        # fused QKV, bf16 MXU
                  preferred_element_type=f32) + bqkv_ref[...]   # (L, 3D) f32
    qkv = qkv.astype(bf16)                         # single bf16 cast for all heads
    mask = mask_ref[...] if has_mask else None     # hoisted out of the head loops

    # A @ B^T: contract last dims of both operands (no explicit transpose).
    dn_qkt = (((1,), (1,)), ((), ()))

    for g in range(n_groups):                      # 128-lane-wide head groups
        outs = []
        for hh in range(heads_per_group):
            c0 = (g * heads_per_group + hh) * hd
            qh = qkv[:, c0:c0 + hd]                # 1/sqrt(hd) folded into w_qkv
            kh = qkv[:, D + c0:D + c0 + hd]
            vh = qkv[:, 2 * D + c0:2 * D + c0 + hd]
            s = lax.dot_general(qh, kh, dn_qkt,
                                preferred_element_type=f32)     # (L, L) f32
            if has_mask:
                s = s + mask
            s = s - jnp.max(s, axis=-1, keepdims=True)
            p = jnp.exp(s)
            p = p * pl.reciprocal(jnp.sum(p, axis=-1, keepdims=True),
                                  approx=True)
            outs.append(jnp.dot(p.astype(bf16), vh,
                                preferred_element_type=f32).astype(bf16))
        grp = outs[0] if len(outs) == 1 else jnp.concatenate(outs, axis=-1)
        attn_ref[:, g * gw:(g + 1) * gw] = grp     # lane-dense group store

    attn_out = jnp.dot(attn_ref[...], wo_ref[...],
                       preferred_element_type=f32) + bo_ref[...]
    # Re-read x_ref at the residual add (keeps the residual live range short).
    o_ref[...] = x_ref[...] + attn_out

    # ---- MLP branch, chunked over the sequence dimension ---------------------
    ln2w = ln2w_ref[...]                           # hoisted (no per-chunk reload
    ln2b = ln2b_ref[...]                           #  / re-broadcast of params)
    bfc = bfc_ref[...]
    bpr = bpr_ref[...]
    n_chunks = L // mlp_chunk

    def mlp_chunk_body(ci):
        start = pl.multiple_of(ci * mlp_chunk, mlp_chunk)
        rows = o_ref[pl.ds(start, mlp_chunk), :]   # (chunk, D) f32 residual
        h2 = layer_norm(rows, ln2w, ln2b)
        m = jnp.dot(h2.astype(bf16), wfc_ref[...],
                    preferred_element_type=f32) + bfc           # (chunk, 4D)
        m = m * jax.nn.sigmoid(1.702 * m)          # QuickGELU in f32 (EUP)
        mo = jnp.dot(m.astype(bf16), wpr_ref[...],
                     preferred_element_type=f32) + bpr          # (chunk, D)
        o_ref[pl.ds(start, mlp_chunk), :] = rows + mo

    if n_chunks <= 4:
        for ci in range(n_chunks):                 # unrolled: LLO visibility
            mlp_chunk_body(ci)
    else:
        def body(ci, carry):
            mlp_chunk_body(ci)
            return carry
        lax.fori_loop(0, n_chunks, body, 0)


# ----------------------------------------------------------------------------
# Wrapper: one residual attention block over the whole batch
# ----------------------------------------------------------------------------
def resblock_pallas(x_nld, params, attn_mask=None, *, d_model, n_head):
    N, L, D = x_nld.shape
    assert D == d_model and D % n_head == 0
    hd = D // n_head

    # Head grouping: make per-group loads/stores >= 128 lanes when possible.
    if hd < 128:
        heads_per_group = min(n_head, max(1, 128 // hd))
        while n_head % heads_per_group:
            heads_per_group -= 1
    else:
        heads_per_group = 1

    # MLP sequence-chunk: largest of 512/256/128 that divides L, else full L.
    mlp_chunk = next((c for c in (512, 256, 128) if L % c == 0), L)

    in_specs = [pl.BlockSpec((None, L, D), lambda b: (b, 0, 0))]
    ordered = []
    for name in WEIGHT_ORDER:
        p = params[name]
        ordered.append(p)
        in_specs.append(_const_weight_spec(p.shape))

    has_mask = attn_mask is not None
    if has_mask:
        attn_mask = jnp.asarray(attn_mask, jnp.float32)
        assert attn_mask.shape == (L, L)
        ordered.append(attn_mask)
        in_specs.append(_const_weight_spec(attn_mask.shape))

    kernel = partial(_resblock_kernel, d_model=d_model, n_head=n_head,
                     heads_per_group=heads_per_group, mlp_chunk=mlp_chunk,
                     has_mask=has_mask)

    return pl.pallas_call(
        kernel,
        out_shape=jax.ShapeDtypeStruct((N, L, D), jnp.float32),
        grid_spec=pltpu.PrefetchScalarGridSpec(
            num_scalar_prefetch=0,
            grid=(N,),
            in_specs=in_specs,
            out_specs=pl.BlockSpec((None, L, D), lambda b: (b, 0, 0)),
            scratch_shapes=[pltpu.VMEM((L, D), jnp.bfloat16)],
        ),
        input_output_aliases={0: 0},               # reuse activation buffer
        compiler_params=pltpu.CompilerParams(
            dimension_semantics=("parallel",),
            vmem_limit_bytes=_vmem_limit_bytes(),
        ),
    )(x_nld, *ordered)


def transformer_pallas(x_lnd, layer_params, attn_mask=None, *, d_model, n_head):
    """x_lnd: (L, N, D) float32 — PyTorch MultiheadAttention layout."""
    x = jnp.transpose(x_lnd, (1, 0, 2))            # (N, L, D) internally
    for params in layer_params:
        x = resblock_pallas(x, params, attn_mask, d_model=d_model, n_head=n_head)
    return jnp.transpose(x, (1, 0, 2))             # back to (L, N, D)


# ----------------------------------------------------------------------------
# Parameter init (PyTorch-style f32 params) + conversion to kernel layout
# ----------------------------------------------------------------------------
def init_torch_params(key, d_model):
    D = d_model
    ks = jax.random.split(key, 10)
    s = 0.02
    return {
        "in_proj_w": s * jax.random.normal(ks[0], (3 * D, D), jnp.float32),
        "in_proj_b": s * jax.random.normal(ks[1], (3 * D,), jnp.float32),
        "out_w": s * jax.random.normal(ks[2], (D, D), jnp.float32),
        "out_b": s * jax.random.normal(ks[3], (D,), jnp.float32),
        "fc_w": s * jax.random.normal(ks[4], (4 * D, D), jnp.float32),
        "fc_b": s * jax.random.normal(ks[5], (4 * D,), jnp.float32),
        "pr_w": s * jax.random.normal(ks[6], (D, 4 * D), jnp.float32),
        "pr_b": s * jax.random.normal(ks[7], (D,), jnp.float32),
        "ln1_w": 1.0 + 0.01 * jax.random.normal(ks[8], (D,), jnp.float32),
        "ln1_b": jnp.zeros((D,), jnp.float32),
        "ln2_w": 1.0 + 0.01 * jax.random.normal(ks[9], (D,), jnp.float32),
        "ln2_b": jnp.zeros((D,), jnp.float32),
    }


def prepare_kernel_params(tp, d_model, n_head):
    """Transpose to x@W layout, fuse QKV, fold softmax scale into Q, cast
    matmul weights to bf16 (biases / LN params stay f32)."""
    D = d_model
    scale = 1.0 / math.sqrt(D // n_head)
    wq = tp["in_proj_w"][0 * D:1 * D].T * scale
    wk = tp["in_proj_w"][1 * D:2 * D].T
    wv = tp["in_proj_w"][2 * D:3 * D].T
    bq = tp["in_proj_b"][0 * D:1 * D] * scale
    bk = tp["in_proj_b"][1 * D:2 * D]
    bv = tp["in_proj_b"][2 * D:3 * D]

    bf16 = lambda a: a.astype(jnp.bfloat16)
    r1 = lambda a: a.reshape(1, -1).astype(jnp.float32)
    return {
        "ln1_w": r1(tp["ln1_w"]), "ln1_b": r1(tp["ln1_b"]),
        "w_qkv": bf16(jnp.concatenate([wq, wk, wv], axis=1)),
        "b_qkv": r1(jnp.concatenate([bq, bk, bv])),
        "w_o": bf16(tp["out_w"].T), "b_o": r1(tp["out_b"]),
        "ln2_w": r1(tp["ln2_w"]), "ln2_b": r1(tp["ln2_b"]),
        "w_fc": bf16(tp["fc_w"].T), "b_fc": r1(tp["fc_b"]),
        "w_pr": bf16(tp["pr_w"].T), "b_pr": r1(tp["pr_b"]),
    }


# ----------------------------------------------------------------------------
# Pure-JAX f32 reference (mirrors the PyTorch forward) for correctness check
# ----------------------------------------------------------------------------
def _ref_block(x, tp, n_head, mask=None):
    L, D = x.shape
    hd = D // n_head

    def ln(v, w, b):
        mu = v.mean(-1, keepdims=True)
        var = ((v - mu) ** 2).mean(-1, keepdims=True)
        return (v - mu) / jnp.sqrt(var + 1e-5) * w + b

    h = ln(x, tp["ln1_w"], tp["ln1_b"])
    qkv = h @ tp["in_proj_w"].T + tp["in_proj_b"]
    q, k, v = jnp.split(qkv, 3, axis=-1)
    qh = q.reshape(L, n_head, hd).transpose(1, 0, 2) / math.sqrt(hd)
    kh = k.reshape(L, n_head, hd).transpose(1, 0, 2)
    vh = v.reshape(L, n_head, hd).transpose(1, 0, 2)
    s = jnp.einsum("hqd,hkd->hqk", qh, kh)
    if mask is not None:
        s = s + mask
    pa = jax.nn.softmax(s, axis=-1)
    a = jnp.einsum("hqk,hkd->hqd", pa, vh).transpose(1, 0, 2).reshape(L, D)
    x = x + (a @ tp["out_w"].T + tp["out_b"])
    h2 = ln(x, tp["ln2_w"], tp["ln2_b"])
    m = h2 @ tp["fc_w"].T + tp["fc_b"]
    m = m * jax.nn.sigmoid(1.702 * m)
    return x + (m @ tp["pr_w"].T + tp["pr_b"])


def transformer_ref(x_lnd, torch_params, n_head, mask=None):
    x = x_lnd
    for tp in torch_params:
        x = jax.vmap(lambda xb: _ref_block(xb, tp, n_head, mask),
                     in_axes=1, out_axes=1)(x)
    return x


# ----------------------------------------------------------------------------
if __name__ == "__main__":
    # small config: width=32, layers=2, heads=4, seq=8, batch=2
    L, N, D, H, LAYERS = 8, 2, 32, 4, 2

    # Run the capability probe eagerly (outside any jit trace).
    _single_buffer_supported()

    root = jax.random.PRNGKey(0)
    kx, *kl = jax.random.split(root, 1 + LAYERS)
    x = jax.random.normal(kx, (L, N, D), jnp.float32)

    torch_params = [init_torch_params(kl[i], D) for i in range(LAYERS)]
    kernel_params = [prepare_kernel_params(tp, D, H) for tp in torch_params]

    fwd = jax.jit(partial(transformer_pallas, d_model=D, n_head=H))

    # --- no attention mask (module default attn_mask=None) -------------------
    out = jax.block_until_ready(fwd(x, kernel_params))
    ref = jax.block_until_ready(transformer_ref(x, torch_params, H))
    # bf16 matmul inputs (f32 accumulation) -> loosen tolerance vs the f32 reference
    np.testing.assert_allclose(np.asarray(out), np.asarray(ref),
                               rtol=2e-2, atol=2e-2)

    # --- causal additive mask (CLIP text tower) -------------------------------
    mask = jnp.triu(jnp.full((L, L), float("-inf"), jnp.float32), k=1)
    out_m = jax.block_until_ready(fwd(x, kernel_params, mask))
    ref_m = jax.block_until_ready(transformer_ref(x, torch_params, H, mask))
    np.testing.assert_allclose(np.asarray(out_m), np.asarray(ref_m),
                               rtol=2e-2, atol=2e-2)

    print("KERNEL_OK")
</pallas_src>

<mosaic_0001>
module attributes {stable_mosaic.version = 11 : i64} {
  func.func @_probe(%arg0: i32, %arg1: memref<8x128xf32, #tpu.memory_space<vmem>>, %arg2: memref<8x128xf32, #tpu.memory_space<vmem>>) attributes {dimension_semantics = [#tpu.dimension_semantics<arbitrary>], iteration_bounds = array<i64: 2>, scalar_prefetch = 0 : i64, scratch_operands = 0 : i64, tpu.core_type = #tpu.core_type<tc>, window_params = [{pipeline_mode = #tpu.pipeline_mode<synchronous>, transform_indices = @transform_0, window_bounds = array<i64: 8, 128>}, {pipeline_mode = #tpu.pipeline_mode<synchronous>, transform_indices = @transform_1, window_bounds = array<i64: 8, 128>}]} {
    %c0 = arith.constant 0 : index
    %c0_0 = arith.constant 0 : index
    %0 = vector.load %arg1[%c0, %c0_0] : memref<8x128xf32, #tpu.memory_space<vmem>>, vector<8x128xf32>
    %cst = arith.constant 1.000000e+00 : f32
    %1 = vector.broadcast %cst : f32 to vector<8x128xf32>
    %2 = arith.addf %0, %1 : vector<8x128xf32>
    %c0_1 = arith.constant 0 : index
    %c0_2 = arith.constant 0 : index
    %3 = vector.load %arg2[%c0_1, %c0_2] : memref<8x128xf32, #tpu.memory_space<vmem>>, vector<8x128xf32>
    tpu.vector_store %arg2[%c0_1, %c0_2], %2 {strides = array<i32>} : memref<8x128xf32, #tpu.memory_space<vmem>>, vector<8x128xf32>,
    return
  }
  func.func @transform_0(%arg0: i32) -> (i32, i32) {
    %c0_i32 = arith.constant 0 : i32
    %c0_i32_0 = arith.constant 0 : i32
    %c0_i32_1 = arith.constant 0 : i32
    return %c0_i32, %c0_i32_0 : i32, i32
  }
  func.func @transform_1(%arg0: i32) -> (i32, i32) {
    %c0_i32 = arith.constant 0 : i32
    %c0_i32_0 = arith.constant 0 : i32
    %c0_i32_1 = arith.constant 0 : i32
    return %c0_i32, %c0_i32_0 : i32, i32
  }
}

module attributes {stable_mosaic.version = 11 : i64} {
  func.func @_resblock_kernel(%arg0: i32, %arg1: memref<1x8x32xf32, #tpu.memory_space<vmem>>, %arg2: memref<1x32xf32, #tpu.memory_space<vmem>>, %arg3: memref<1x32xf32, #tpu.memory_space<vmem>>, %arg4: memref<32x96xbf16, #tpu.memory_space<vmem>>, %arg5: memref<1x96xf32, #tpu.memory_space<vmem>>, %arg6: memref<32x32xbf16, #tpu.memory_space<vmem>>, %arg7: memref<1x32xf32, #tpu.memory_space<vmem>>, %arg8: memref<1x32xf32, #tpu.memory_space<vmem>>, %arg9: memref<1x32xf32, #tpu.memory_space<vmem>>, %arg10: memref<32x128xbf16, #tpu.memory_space<vmem>>, %arg11: memref<1x128xf32, #tpu.memory_space<vmem>>, %arg12: memref<128x32xbf16, #tpu.memory_space<vmem>>, %arg13: memref<1x32xf32, #tpu.memory_space<vmem>>, %arg14: memref<1x8x32xf32, #tpu.memory_space<vmem>>, %arg15: memref<8x32xbf16, #tpu.memory_space<vmem>>) attributes {dimension_semantics = [#tpu.dimension_semantics<parallel>], iteration_bounds = array<i64: 2>, scalar_prefetch = 0 : i64, scratch_operands = 1 : i64, tpu.core_type = #tpu.core_type<tc>, window_params = [{transform_indices = @transform_0, window_bounds = array<i64: 1, 8, 32>}, {pipeline_mode = #tpu.pipeline_mode<synchronous>, transform_indices = @transform_1, window_bounds = array<i64: 1, 32>}, {pipeline_mode = #tpu.pipeline_mode<synchronous>, transform_indices = @transform_2, window_bounds = array<i64: 1, 32>}, {pipeline_mode = #tpu.pipeline_mode<synchronous>, transform_indices = @transform_3, window_bounds = array<i64: 32, 96>}, {pipeline_mode = #tpu.pipeline_mode<synchronous>, transform_indices = @transform_4, window_bounds = array<i64: 1, 96>}, {pipeline_mode = #tpu.pipeline_mode<synchronous>, transform_indices = @transform_5, window_bounds = array<i64: 32, 32>}, {pipeline_mode = #tpu.pipeline_mode<synchronous>, transform_indices = @transform_6, window_bounds = array<i64: 1, 32>}, {pipeline_mode = #tpu.pipeline_mode<synchronous>, transform_indices = @transform_7, window_bounds = array<i64: 1, 32>}, {pipeline_mode = #tpu.pipeline_mode<synchronous>, transform_indices = @transform_8, window_bounds = array<i64: 1, 32>}, {pipeline_mode = #tpu.pipeline_mode<synchronous>, transform_indices = @transform_9, window_bounds = array<i64: 32, 128>}, {pipeline_mode = #tpu.pipeline_mode<synchronous>, transform_indices = @transform_10, window_bounds = array<i64: 1, 128>}, {pipeline_mode = #tpu.pipeline_mode<synchronous>, transform_indices = @transform_11, window_bounds = array<i64: 128, 32>}, {pipeline_mode = #tpu.pipeline_mode<synchronous>, transform_indices = @transform_12, window_bounds = array<i64: 1, 32>}, {transform_indices = @transform_13, window_bounds = array<i64: 1, 8, 32>}]} {
    %c0 = arith.constant 0 : index
    %c0_0 = arith.constant 0 : index
    %c0_1 = arith.constant 0 : index
    %0 = vector.load %arg1[%c0, %c0_0, %c0_1] : memref<1x8x32xf32, #tpu.memory_space<vmem>>, vector<1x8x32xf32>
    %1 = vector.shape_cast %0 : vector<1x8x32xf32> to vector<8x32xf32>
    %c0_2 = arith.constant 0 : index
    %c0_3 = arith.constant 0 : index
    %2 = vector.load %arg2[%c0_2, %c0_3] : memref<1x32xf32, #tpu.memory_space<vmem>>, vector<1x32xf32>
    %c0_4 = arith.constant 0 : index
    %c0_5 = arith.constant 0 : index
    %3 = vector.load %arg3[%c0_4, %c0_5] : memref<1x32xf32, #tpu.memory_space<vmem>>, vector<1x32xf32>
    %cst = arith.constant dense<0.000000e+00> : vector<8xf32>
    %4 = vector.multi_reduction <add>, %1, %cst [1] : vector<8x32xf32> to vector<8xf32>
    %5 = vector.shape_cast %4 : vector<8xf32> to vector<8x1xf32>
    %cst_6 = arith.constant 3.200000e+01 : f32
    %6 = vector.broadcast %cst_6 : f32 to vector<8x1xf32>
    %7 = arith.divf %5, %6 : vector<8x1xf32>
    %8 = vector.broadcast %7 : vector<8x1xf32> to vector<8x32xf32>
    %9 = arith.subf %1, %8 : vector<8x32xf32>
    %10 = arith.mulf %9, %9 : vector<8x32xf32>
    %cst_7 = arith.constant dense<0.000000e+00> : vector<8xf32>
    %11 = vector.multi_reduction <add>, %10, %cst_7 [1] : vector<8x32xf32> to vector<8xf32>
    %12 = vector.shape_cast %11 : vector<8xf32> to vector<8x1xf32>
    %cst_8 = arith.constant 3.200000e+01 : f32
    %13 = vector.broadcast %cst_8 : f32 to vector<8x1xf32>
    %14 = arith.divf %12, %13 : vector<8x1xf32>
    %cst_9 = arith.constant 9.99999974E-6 : f32
    %15 = vector.broadcast %cst_9 : f32 to vector<8x1xf32>
    %16 = arith.addf %14, %15 : vector<8x1xf32>
    %17 = math.rsqrt %16 : vector<8x1xf32>
    %18 = vector.broadcast %17 : vector<8x1xf32> to vector<8x32xf32>
    %19 = arith.mulf %9, %18 : vector<8x32xf32>
    %20 = vector.broadcast %2 : vector<1x32xf32> to vector<8x32xf32>
    %21 = arith.mulf %19, %20 : vector<8x32xf32>
    %22 = vector.broadcast %3 : vector<1x32xf32> to vector<8x32xf32>
    %23 = arith.addf %21, %22 : vector<8x32xf32>
    %24 = arith.truncf %23 : vector<8x32xf32> to vector<8x32xbf16>
    %c0_10 = arith.constant 0 : index
    %c0_11 = arith.constant 0 : index
    %25 = vector.load %arg4[%c0_10, %c0_11] : memref<32x96xbf16, #tpu.memory_space<vmem>>, vector<32x96xbf16>
    %cst_12 = arith.constant dense<0.000000e+00> : vector<8x96xf32>
    %26 = tpu.matmul %24, %25, %cst_12 {dimension_numbers = #tpu.dot_dimension_numbers<[1], [0], [0], [1], [0, 0, 1, 1], [], []>} : vector<8x32xbf16>, vector<32x96xbf16>, vector<8x96xf32> -> vector<8x96xf32>
    %c0_13 = arith.constant 0 : index
    %c0_14 = arith.constant 0 : index
    %27 = vector.load %arg5[%c0_13, %c0_14] : memref<1x96xf32, #tpu.memory_space<vmem>>, vector<1x96xf32>
    %28 = vector.broadcast %27 : vector<1x96xf32> to vector<8x96xf32>
    %29 = arith.addf %26, %28 : vector<8x96xf32>
    %30 = arith.truncf %29 : vector<8x96xf32> to vector<8x96xbf16>
    %31 = vector.extract_strided_slice %30 {offsets = [0, 0], sizes = [8, 8], strides = [1, 1]} : vector<8x96xbf16> to vector<8x8xbf16>
    %32 = vector.extract_strided_slice %30 {offsets = [0, 32], sizes = [8, 8], strides = [1, 1]} : vector<8x96xbf16> to vector<8x8xbf16>
    %33 = vector.extract_strided_slice %30 {offsets = [0, 64], sizes = [8, 8], strides = [1, 1]} : vector<8x96xbf16> to vector<8x8xbf16>
    %cst_15 = arith.constant dense<0.000000e+00> : vector<8x8xf32>
    %34 = tpu.matmul %31, %32, %cst_15 {dimension_numbers = #tpu.dot_dimension_numbers<[1], [1], [0], [0], [0, 0, 1, 0], [], []>} : vector<8x8xbf16>, vector<8x8xbf16>, vector<8x8xf32> -> vector<8x8xf32>
    %cst_16 = arith.constant dense<0xFF800000> : vector<8xf32>
    %35 = vector.multi_reduction <maximumf>, %34, %cst_16 [1] : vector<8x8xf32> to vector<8xf32>
    %36 = vector.shape_cast %35 : vector<8xf32> to vector<8x1xf32>
    %37 = vector.broadcast %36 : vector<8x1xf32> to vector<8x8xf32>
    %38 = arith.subf %34, %37 : vector<8x8xf32>
    %39 = math.exp %38 : vector<8x8xf32>
    %cst_17 = arith.constant dense<0.000000e+00> : vector<8xf32>
    %40 = vector.multi_reduction <add>, %39, %cst_17 [1] : vector<8x8xf32> to vector<8xf32>
    %41 = vector.shape_cast %40 : vector<8xf32> to vector<8x1xf32>
    %42 = tpu.reciprocal %41 {approx = true} : vector<8x1xf32> -> vector<8x1xf32>
    %43 = vector.broadcast %42 : vector<8x1xf32> to vector<8x8xf32>
    %44 = arith.mulf %39, %43 : vector<8x8xf32>
    %45 = arith.truncf %44 : vector<8x8xf32> to vector<8x8xbf16>
    %cst_18 = arith.constant dense<0.000000e+00> : vector<8x8xf32>
    %46 = tpu.matmul %45, %33, %cst_18 {dimension_numbers = #tpu.dot_dimension_numbers<[1], [0], [0], [1], [0, 0, 1, 1], [], []>} : vector<8x8xbf16>, vector<8x8xbf16>, vector<8x8xf32> -> vector<8x8xf32>
    %47 = arith.truncf %46 : vector<8x8xf32> to vector<8x8xbf16>
    %48 = vector.extract_strided_slice %30 {offsets = [0, 8], sizes = [8, 8], strides = [1, 1]} : vector<8x96xbf16> to vector<8x8xbf16>
    %49 = vector.extract_strided_slice %30 {offsets = [0, 40], sizes = [8, 8], strides = [1, 1]} : vector<8x96xbf16> to vector<8x8xbf16>
    %50 = vector.extract_strided_slice %30 {offsets = [0, 72], sizes = [8, 8], strides = [1, 1]} : vector<8x96xbf16> to vector<8x8xbf16>
    %cst_19 = arith.constant dense<0.000000e+00> : vector<8x8xf32>
    %51 = tpu.matmul %48, %49, %cst_19 {dimension_numbers = #tpu.dot_dimension_numbers<[1], [1], [0], [0], [0, 0, 1, 0], [], []>} : vector<8x8xbf16>, vector<8x8xbf16>, vector<8x8xf32> -> vector<8x8xf32>
    %cst_20 = arith.constant dense<0xFF800000> : vector<8xf32>
    %52 = vector.multi_reduction <maximumf>, %51, %cst_20 [1] : vector<8x8xf32> to vector<8xf32>
    %53 = vector.shape_cast %52 : vector<8xf32> to vector<8x1xf32>
    %54 = vector.broadcast %53 : vector<8x1xf32> to vector<8x8xf32>
    %55 = arith.subf %51, %54 : vector<8x8xf32>
    %56 = math.exp %55 : vector<8x8xf32>
    %cst_21 = arith.constant dense<0.000000e+00> : vector<8xf32>
    %57 = vector.multi_reduction <add>, %56, %cst_21 [1] : vector<8x8xf32> to vector<8xf32>
    %58 = vector.shape_cast %57 : vector<8xf32> to vector<8x1xf32>
    %59 = tpu.reciprocal %58 {approx = true} : vector<8x1xf32> -> vector<8x1xf32>
    %60 = vector.broadcast %59 : vector<8x1xf32> to vector<8x8xf32>
    %61 = arith.mulf %56, %60 : vector<8x8xf32>
    %62 = arith.truncf %61 : vector<8x8xf32> to vector<8x8xbf16>
    %cst_22 = arith.constant dense<0.000000e+00> : vector<8x8xf32>
    %63 = tpu.matmul %62, %50, %cst_22 {dimension_numbers = #tpu.dot_dimension_numbers<[1], [0], [0], [1], [0, 0, 1, 1], [], []>} : vector<8x8xbf16>, vector<8x8xbf16>, vector<8x8xf32> -> vector<8x8xf32>
    %64 = arith.truncf %63 : vector<8x8xf32> to vector<8x8xbf16>
    %65 = vector.extract_strided_slice %30 {offsets = [0, 16], sizes = [8, 8], strides = [1, 1]} : vector<8x96xbf16> to vector<8x8xbf16>
    %66 = vector.extract_strided_slice %30 {offsets = [0, 48], sizes = [8, 8], strides = [1, 1]} : vector<8x96xbf16> to vector<8x8xbf16>
    %67 = vector.extract_strided_slice %30 {offsets = [0, 80], sizes = [8, 8], strides = [1, 1]} : vector<8x96xbf16> to vector<8x8xbf16>
    %cst_23 = arith.constant dense<0.000000e+00> : vector<8x8xf32>
    %68 = tpu.matmul %65, %66, %cst_23 {dimension_numbers = #tpu.dot_dimension_numbers<[1], [1], [0], [0], [0, 0, 1, 0], [], []>} : vector<8x8xbf16>, vector<8x8xbf16>, vector<8x8xf32> -> vector<8x8xf32>
    %cst_24 = arith.constant dense<0xFF800000> : vector<8xf32>
    %69 = vector.multi_reduction <maximumf>, %68, %cst_24 [1] : vector<8x8xf32> to vector<8xf32>
    %70 = vector.shape_cast %69 : vector<8xf32> to vector<8x1xf32>
    %71 = vector.broadcast %70 : vector<8x1xf32> to vector<8x8xf32>
    %72 = arith.subf %68, %71 : vector<8x8xf32>
    %73 = math.exp %72 : vector<8x8xf32>
    %cst_25 = arith.constant dense<0.000000e+00> : vector<8xf32>
    %74 = vector.multi_reduction <add>, %73, %cst_25 [1] : vector<8x8xf32> to vector<8xf32>
    %75 = vector.shape_cast %74 : vector<8xf32> to vector<8x1xf32>
    %76 = tpu.reciprocal %75 {approx = true} : vector<8x1xf32> -> vector<8x1xf32>
    %77 = vector.broadcast %76 : vector<8x1xf32> to vector<8x8xf32>
    %78 = arith.mulf %73, %77 : vector<8x8xf32>
    %79 = arith.truncf %78 : vector<8x8xf32> to vector<8x8xbf16>
    %cst_26 = arith.constant dense<0.000000e+00> : vector<8x8xf32>
    %80 = tpu.matmul %79, %67, %cst_26 {dimension_numbers = #tpu.dot_dimension_numbers<[1], [0], [0], [1], [0, 0, 1, 1], [], []>} : vector<8x8xbf16>, vector<8x8xbf16>, vector<8x8xf32> -> vector<8x8xf32>
    %81 = arith.truncf %80 : vector<8x8xf32> to vector<8x8xbf16>
    %82 = vector.extract_strided_slice %30 {offsets = [0, 24], sizes = [8, 8], strides = [1, 1]} : vector<8x96xbf16> to vector<8x8xbf16>
    %83 = vector.extract_strided_slice %30 {offsets = [0, 56], sizes = [8, 8], strides = [1, 1]} : vector<8x96xbf16> to vector<8x8xbf16>
    %84 = vector.extract_strided_slice %30 {offsets = [0, 88], sizes = [8, 8], strides = [1, 1]} : vector<8x96xbf16> to vector<8x8xbf16>
    %cst_27 = arith.constant dense<0.000000e+00> : vector<8x8xf32>
    %85 = tpu.matmul %82, %83, %cst_27 {dimension_numbers = #tpu.dot_dimension_numbers<[1], [1], [0], [0], [0, 0, 1, 0], [], []>} : vector<8x8xbf16>, vector<8x8xbf16>, vector<8x8xf32> -> vector<8x8xf32>
    %cst_28 = arith.constant dense<0xFF800000> : vector<8xf32>
    %86 = vector.multi_reduction <maximumf>, %85, %cst_28 [1] : vector<8x8xf32> to vector<8xf32>
    %87 = vector.shape_cast %86 : vector<8xf32> to vector<8x1xf32>
    %88 = vector.broadcast %87 : vector<8x1xf32> to vector<8x8xf32>
    %89 = arith.subf %85, %88 : vector<8x8xf32>
    %90 = math.exp %89 : vector<8x8xf32>
    %cst_29 = arith.constant dense<0.000000e+00> : vector<8xf32>
    %91 = vector.multi_reduction <add>, %90, %cst_29 [1] : vector<8x8xf32> to vector<8xf32>
    %92 = vector.shape_cast %91 : vector<8xf32> to vector<8x1xf32>
    %93 = tpu.reciprocal %92 {approx = true} : vector<8x1xf32> -> vector<8x1xf32>
    %94 = vector.broadcast %93 : vector<8x1xf32> to vector<8x8xf32>
    %95 = arith.mulf %90, %94 : vector<8x8xf32>
    %96 = arith.truncf %95 : vector<8x8xf32> to vector<8x8xbf16>
    %cst_30 = arith.constant dense<0.000000e+00> : vector<8x8xf32>
    %97 = tpu.matmul %96, %84, %cst_30 {dimension_numbers = #tpu.dot_dimension_numbers<[1], [0], [0], [1], [0, 0, 1, 1], [], []>} : vector<8x8xbf16>, vector<8x8xbf16>, vector<8x8xf32> -> vector<8x8xf32>
    %98 = arith.truncf %97 : vector<8x8xf32> to vector<8x8xbf16>
    %99 = tpu.concatenate %47, %64, %81, %98 in 1 : vector<8x8xbf16>, vector<8x8xbf16>, vector<8x8xbf16>, vector<8x8xbf16> -> vector<8x32xbf16>
    %c0_31 = arith.constant 0 : index
    %c0_32 = arith.constant 0 : index
    %100 = vector.load %arg15[%c0_31, %c0_32] : memref<8x32xbf16, #tpu.memory_space<vmem>>, vector<8x32xbf16>
    tpu.vector_store %arg15[%c0_31, %c0_32], %99 {strides = array<i32>} : memref<8x32xbf16, #tpu.memory_space<vmem>>, vector<8x32xbf16>,
    %c0_33 = arith.constant 0 : index
    %c0_34 = arith.constant 0 : index
    %101 = vector.load %arg15[%c0_33, %c0_34] : memref<8x32xbf16, #tpu.memory_space<vmem>>, vector<8x32xbf16>
    %c0_35 = arith.constant 0 : index
    %c0_36 = arith.constant 0 : index
    %102 = vector.load %arg6[%c0_35, %c0_36] : memref<32x32xbf16, #tpu.memory_space<vmem>>, vector<32x32xbf16>
    %cst_37 = arith.constant dense<0.000000e+00> : vector<8x32xf32>
    %103 = tpu.matmul %101, %102, %cst_37 {dimension_numbers = #tpu.dot_dimension_numbers<[1], [0], [0], [1], [0, 0, 1, 1], [], []>} : vector<8x32xbf16>, vector<32x32xbf16>, vector<8x32xf32> -> vector<8x32xf32>
    %c0_38 = arith.constant 0 : index
    %c0_39 = arith.constant 0 : index
    %104 = vector.load %arg7[%c0_38, %c0_39] : memref<1x32xf32, #tpu.memory_space<vmem>>, vector<1x32xf32>
    %105 = vector.broadcast %104 : vector<1x32xf32> to vector<8x32xf32>
    %106 = arith.addf %103, %105 : vector<8x32xf32>
    %c0_40 = arith.constant 0 : index
    %c0_41 = arith.constant 0 : index
    %c0_42 = arith.constant 0 : index
    %107 = vector.load %arg1[%c0_40, %c0_41, %c0_42] : memref<1x8x32xf32, #tpu.memory_space<vmem>>, vector<1x8x32xf32>
    %108 = vector.shape_cast %107 : vector<1x8x32xf32> to vector<8x32xf32>
    %109 = arith.addf %108, %106 : vector<8x32xf32>
    %c0_43 = arith.constant 0 : index
    %c0_44 = arith.constant 0 : index
    %c0_45 = arith.constant 0 : index
    %110 = vector.load %arg14[%c0_43, %c0_44, %c0_45] : memref<1x8x32xf32, #tpu.memory_space<vmem>>, vector<1x8x32xf32>
    %111 = vector.shape_cast %110 : vector<1x8x32xf32> to vector<8x32xf32>
    %112 = vector.shape_cast %109 : vector<8x32xf32> to vector<1x8x32xf32>
    tpu.vector_store %arg14[%c0_43, %c0_44, %c0_45], %112 {strides = array<i32>} : memref<1x8x32xf32, #tpu.memory_space<vmem>>, vector<1x8x32xf32>,
    %c0_46 = arith.constant 0 : index
    %c0_47 = arith.constant 0 : index
    %113 = vector.load %arg8[%c0_46, %c0_47] : memref<1x32xf32, #tpu.memory_space<vmem>>, vector<1x32xf32>
    %c0_48 = arith.constant 0 : index
    %c0_49 = arith.constant 0 : index
    %114 = vector.load %arg9[%c0_48, %c0_49] : memref<1x32xf32, #tpu.memory_space<vmem>>, vector<1x32xf32>
    %c0_50 = arith.constant 0 : index
    %c0_51 = arith.constant 0 : index
    %115 = vector.load %arg11[%c0_50, %c0_51] : memref<1x128xf32, #tpu.memory_space<vmem>>, vector<1x128xf32>
    %c0_52 = arith.constant 0 : index
    %c0_53 = arith.constant 0 : index
    %116 = vector.load %arg13[%c0_52, %c0_53] : memref<1x32xf32, #tpu.memory_space<vmem>>, vector<1x32xf32>
    %c0_i32 = arith.constant 0 : i32
    %117 = tpu.assume_multiple %c0_i32, 8 : i32
    %c0_54 = arith.constant 0 : index
    %118 = arith.index_cast %117 : i32 to index
    %c0_55 = arith.constant 0 : index
    %119 = vector.load %arg14[%c0_54, %118, %c0_55] : memref<1x8x32xf32, #tpu.memory_space<vmem>>, vector<1x8x32xf32>
    %120 = vector.shape_cast %119 : vector<1x8x32xf32> to vector<8x32xf32>
    %cst_56 = arith.constant dense<0.000000e+00> : vector<8xf32>
    %121 = vector.multi_reduction <add>, %120, %cst_56 [1] : vector<8x32xf32> to vector<8xf32>
    %122 = vector.shape_cast %121 : vector<8xf32> to vector<8x1xf32>
    %cst_57 = arith.constant 3.200000e+01 : f32
    %123 = vector.broadcast %cst_57 : f32 to vector<8x1xf32>
    %124 = arith.divf %122, %123 : vector<8x1xf32>
    %125 = vector.broadcast %124 : vector<8x1xf32> to vector<8x32xf32>
    %126 = arith.subf %120, %125 : vector<8x32xf32>
    %127 = arith.mulf %126, %126 : vector<8x32xf32>
    %cst_58 = arith.constant dense<0.000000e+00> : vector<8xf32>
    %128 = vector.multi_reduction <add>, %127, %cst_58 [1] : vector<8x32xf32> to vector<8xf32>
    %129 = vector.shape_cast %128 : vector<8xf32> to vector<8x1xf32>
    %cst_59 = arith.constant 3.200000e+01 : f32
    %130 = vector.broadcast %cst_59 : f32 to vector<8x1xf32>
    %131 = arith.divf %129, %130 : vector<8x1xf32>
    %cst_60 = arith.constant 9.99999974E-6 : f32
    %132 = vector.broadcast %cst_60 : f32 to vector<8x1xf32>
    %133 = arith.addf %131, %132 : vector<8x1xf32>
    %134 = math.rsqrt %133 : vector<8x1xf32>
    %135 = vector.broadcast %134 : vector<8x1xf32> to vector<8x32xf32>
    %136 = arith.mulf %126, %135 : vector<8x32xf32>
    %137 = vector.broadcast %113 : vector<1x32xf32> to vector<8x32xf32>
    %138 = arith.mulf %136, %137 : vector<8x32xf32>
    %139 = vector.broadcast %114 : vector<1x32xf32> to vector<8x32xf32>
    %140 = arith.addf %138, %139 : vector<8x32xf32>
    %141 = arith.truncf %140 : vector<8x32xf32> to vector<8x32xbf16>
    %c0_61 = arith.constant 0 : index
    %c0_62 = arith.constant 0 : index
    %142 = vector.load %arg10[%c0_61, %c0_62] : memref<32x128xbf16, #tpu.memory_space<vmem>>, vector<32x128xbf16>
    %cst_63 = arith.constant dense<0.000000e+00> : vector<8x128xf32>
    %143 = tpu.matmul %141, %142, %cst_63 {dimension_numbers = #tpu.dot_dimension_numbers<[1], [0], [0], [1], [0, 0, 1, 1], [], []>} : vector<8x32xbf16>, vector<32x128xbf16>, vector<8x128xf32> -> vector<8x128xf32>
    %144 = vector.broadcast %115 : vector<1x128xf32> to vector<8x128xf32>
    %145 = arith.addf %143, %144 : vector<8x128xf32>
    %cst_64 = arith.constant 1.702000e+00 : f32
    %146 = vector.broadcast %cst_64 : f32 to vector<8x128xf32>
    %147 = arith.mulf %146, %145 : vector<8x128xf32>
    %148 = arith.negf %147 : vector<8x128xf32>
    %149 = math.exp %148 : vector<8x128xf32>
    %cst_65 = arith.constant 1.000000e+00 : f32
    %150 = vector.broadcast %cst_65 : f32 to vector<8x128xf32>
    %151 = arith.addf %150, %149 : vector<8x128xf32>
    %152 = arith.divf %150, %151 : vector<8x128xf32>
    %153 = arith.mulf %145, %152 : vector<8x128xf32>
    %154 = arith.truncf %153 : vector<8x128xf32> to vector<8x128xbf16>
    %c0_66 = arith.constant 0 : index
    %c0_67 = arith.constant 0 : index
    %155 = vector.load %arg12[%c0_66, %c0_67] : memref<128x32xbf16, #tpu.memory_space<vmem>>, vector<128x32xbf16>
    %cst_68 = arith.constant dense<0.000000e+00> : vector<8x32xf32>
    %156 = tpu.matmul %154, %155, %cst_68 {dimension_numbers = #tpu.dot_dimension_numbers<[1], [0], [0], [1], [0, 0, 1, 1], [], []>} : vector<8x128xbf16>, vector<128x32xbf16>, vector<8x32xf32> -> vector<8x32xf32>
    %157 = vector.broadcast %116 : vector<1x32xf32> to vector<8x32xf32>
    %158 = arith.addf %156, %157 : vector<8x32xf32>
    %159 = arith.addf %120, %158 : vector<8x32xf32>
    %c0_69 = arith.constant 0 : index
    %160 = arith.index_cast %117 : i32 to index
    %c0_70 = arith.constant 0 : index
    %161 = vector.load %arg14[%c0_69, %160, %c0_70] : memref<1x8x32xf32, #tpu.memory_space<vmem>>, vector<1x8x32xf32>
    %162 = vector.shape_cast %161 : vector<1x8x32xf32> to vector<8x32xf32>
    %163 = vector.shape_cast %159 : vector<8x32xf32> to vector<1x8x32xf32>
    tpu.vector_store %arg14[%c0_69, %160, %c0_70], %163 {strides = array<i32>} : memref<1x8x32xf32, #tpu.memory_space<vmem>>, vector<1x8x32xf32>,
    return
  }
  func.func @transform_0(%arg0: i32) -> (i32, i32, i32) {
    %c0_i32 = arith.constant 0 : i32
    %c0_i32_0 = arith.constant 0 : i32
    %c0_i32_1 = arith.constant 0 : i32
    return %arg0, %c0_i32, %c0_i32_0 : i32, i32, i32
  }
  func.func @transform_1(%arg0: i32) -> (i32, i32) {
    %c0_i32 = arith.constant 0 : i32
    %c0_i32_0 = arith.constant 0 : i32
    %c0_i32_1 = arith.constant 0 : i32
    return %c0_i32, %c0_i32_0 : i32, i32
  }
  func.func @transform_2(%arg0: i32) -> (i32, i32) {
    %c0_i32 = arith.constant 0 : i32
    %c0_i32_0 = arith.constant 0 : i32
    %c0_i32_1 = arith.constant 0 : i32
    return %c0_i32, %c0_i32_0 : i32, i32
  }
  func.func @transform_3(%arg0: i32) -> (i32, i32) {
    %c0_i32 = arith.constant 0 : i32
    %c0_i32_0 = arith.constant 0 : i32
    %c0_i32_1 = arith.constant 0 : i32
    return %c0_i32, %c0_i32_0 : i32, i32
  }
  func.func @transform_4(%arg0: i32) -> (i32, i32) {
    %c0_i32 = arith.constant 0 : i32
    %c0_i32_0 = arith.constant 0 : i32
    %c0_i32_1 = arith.constant 0 : i32
    return %c0_i32, %c0_i32_0 : i32, i32
  }
  func.func @transform_5(%arg0: i32) -> (i32, i32) {
    %c0_i32 = arith.constant 0 : i32
    %c0_i32_0 = arith.constant 0 : i32
    %c0_i32_1 = arith.constant 0 : i32
    return %c0_i32, %c0_i32_0 : i32, i32
  }
  func.func @transform_6(%arg0: i32) -> (i32, i32) {
    %c0_i32 = arith.constant 0 : i32
    %c0_i32_0 = arith.constant 0 : i32
    %c0_i32_1 = arith.constant 0 : i32
    return %c0_i32, %c0_i32_0 : i32, i32
  }
  func.func @transform_7(%arg0: i32) -> (i32, i32) {
    %c0_i32 = arith.constant 0 : i32
    %c0_i32_0 = arith.constant 0 : i32
    %c0_i32_1 = arith.constant 0 : i32
    return %c0_i32, %c0_i32_0 : i32, i32
  }
  func.func @transform_8(%arg0: i32) -> (i32, i32) {
    %c0_i32 = arith.constant 0 : i32
    %c0_i32_0 = arith.constant 0 : i32
    %c0_i32_1 = arith.constant 0 : i32
    return %c0_i32, %c0_i32_0 : i32, i32
  }
  func.func @transform_9(%arg0: i32) -> (i32, i32) {
    %c0_i32 = arith.constant 0 : i32
    %c0_i32_0 = arith.constant 0 : i32
    %c0_i32_1 = arith.constant 0 : i32
    return %c0_i32, %c0_i32_0 : i32, i32
  }
  func.func @transform_10(%arg0: i32) -> (i32, i32) {
    %c0_i32 = arith.constant 0 : i32
    %c0_i32_0 = arith.constant 0 : i32
    %c0_i32_1 = arith.constant 0 : i32
    return %c0_i32, %c0_i32_0 : i32, i32
  }
  func.func @transform_11(%arg0: i32) -> (i32, i32) {
    %c0_i32 = arith.constant 0 : i32
    %c0_i32_0 = arith.constant 0 : i32
    %c0_i32_1 = arith.constant 0 : i32
    return %c0_i32, %c0_i32_0 : i32, i32
  }
  func.func @transform_12(%arg0: i32) -> (i32, i32) {
    %c0_i32 = arith.constant 0 : i32
    %c0_i32_0 = arith.constant 0 : i32
    %c0_i32_1 = arith.constant 0 : i32
    return %c0_i32, %c0_i32_0 : i32, i32
  }
  func.func @transform_13(%arg0: i32) -> (i32, i32, i32) {
    %c0_i32 = arith.constant 0 : i32
    %c0_i32_0 = arith.constant 0 : i32
    %c0_i32_1 = arith.constant 0 : i32
    return %arg0, %c0_i32, %c0_i32_0 : i32, i32, i32
  }
}

</mosaic_0001>

<bundles_post_ra>
// kernel: tpu_custom_call.1
= control target key start
LH: loop header
LB: loop body
LE: loop exit
PB: predicated region body
PF: predicated region fallthrough
CT: control target
= control target key end

     0   :  { %6 = vsyncpa [#allocation3], 0  ;;  %s287_s0 = inlined_call_operand.hbm [shape: f32[8,128], index: 0, kind: input, shape index: {}]   ;;  %s288_s1 = inlined_call_operand.hbm [shape: f32[8,128], index: 1, kind: output, shape index: {}]  }
   0x1   :  { %7 = vsyncpa [#allocation4], 0  ;;  %s270_s6 = smov 0  }
   0x2 LB: > { %s149_s7 = sadd.s32 4294967295, %s256_s6   ;;  %p150_p0 = scmp.ge.s32.totalorder %s256_s6, 1  ;;  %s256_s6 = sphi %s270_s6, %s13_s6  }
   0x3   : > { %p60_p1 = scmp.lt.s32.totalorder %s256_s6, 3  ;;  %s72_s10 = sshll.u32 %s287_s0, 4  ;;  %s73_s10 = int_to_ptr.hbm [resolvable:$true] %s72_s10 }
   0x4   : > { %p170_p3 = scmp.eq.s32.totalorder %s149_s7, 0  ;;  %s258_s11 = smov [#allocation2]  }
   0x5   : > { %p61_p2 = pnand %p150_p0, %p60_p1  ;;  %s74_s12 = sshll.u32 %s258_s11, 4  ;;  %s75_s12 = int_to_ptr.vmem [resolvable:$true] %s74_s12 }
   0x7   : > { %p166_p4 = pneg %p61_p2  ;;  %87 = sbr.rel (%p61_p2) target bundleno = 20 (0x14), region = 24 }
   0x9   : > { %p167_p5 = pnand %p170_p3, %p166_p4 }
   0xb   : > { %169 = dma.hbm_to_vmem [thread:$0]  (!%p167_p5), %s73_s10, 128, %s75_s12, [#allocation3]  }
   0xc   : > { %247 = dma.done.wait (%p170_p3), [#allocation3], 128  }
   0xd   : > { %249 = vsyncadd (%p170_p3), [#allocation3], 4294967168  ;;  %s259_s13 = smov [#allocation5]   ;;  %s109_s17 = sshll.u32 %s288_s1, 4  ;;  %v98_v0 = vld [vmem:[#allocation2] sm:$0xff]  ;;  %s110_s17 = int_to_ptr.hbm [resolvable:$true] %s109_s17 }
   0xe   : > { %s107_s14 = sshll.u32 %s259_s13, 4  ;;  %p172_p6 = scmp.eq.s32.totalorder %s149_s7, 1  ;;  %v99_v1 = vadd.f32 1.0, %v98_v0  ;;  %s108_s14 = int_to_ptr.vmem [resolvable:$true] %s107_s14 }
  0x10   : > { %100 = vst [vmem:[#allocation5] sm:$0xff] %v99_v1 }
  0x11   : > { %163 = dma.vmem_to_hbm [thread:$0]  (%p172_p6), %s108_s14, 128, %s110_s17, [#allocation4]  }
  0x12   : > { %251 = dma.done.wait (%p172_p6), [#allocation4], 128  }
  0x13   : > { %253 = vsyncadd (%p172_p6), [#allocation4], 4294967168 }
  0x14 PF: > { %s13_s6 = sadd.s32 1, %s256_s6  }
  0x15   : > { %p10_p7 = scmp.ge.s32.totalorder %s13_s6, 4  }
  0x17   :  { %12 = sbr.rel (!%p10_p7) target bundleno = 2 (0x2), region = 53 }
  0x1c   :  { %123 = vsyncpa [#allocation3], 1 }
  0x1d   :  { %125 = vsyncpa [#allocation3 + $0x1], 1 }
  0x1e   :  { %126 = vsyncpa [#allocation4], 1 }
  0x1f   :  { %128 = vsyncpa [#allocation4 + $0x1], 1 }

// kernel: transformer_pallas.2
= control target key start
LH: loop header
LB: loop body
LE: loop exit
PB: predicated region body
PF: predicated region fallthrough
CT: control target
= control target key end

     0   :  { %s1283_s25 = smov 0   ;;  %s1445_s0 = inlined_call_operand.vmem [shape: f32[2,8,32], index: 0, kind: input, shape index: {}, may-alias: {0,13}]   ;;  %s1446_s1 = inlined_call_operand.vmem [shape: f32[1,32], index: 1, kind: input, shape index: {}]   ;;  %s1447_s2 = inlined_call_operand.vmem [shape: f32[1,32], index: 2, kind: input, shape index: {}]   ;;  %s1448_s3 = inlined_call_operand.vmem [shape: bf16[32,96], index: 3, kind: input, shape index: {}]   ;;  %s1449_s4 = inlined_call_operand.vmem [shape: f32[1,96], index: 4, kind: input, shape index: {}]   ;;  %s1450_s5 = inlined_call_operand.vmem [shape: bf16[32,32], index: 5, kind: input, shape index: {}]   ;;  %s1451_s6 = inlined_call_operand.vmem [shape: f32[1,32], index: 6, kind: input, shape index: {}]   ;;  %s1452_s7 = inlined_call_operand.vmem [shape: f32[1,32], index: 7, kind: input, shape index: {}]   ;;  %s1453_s8 = inlined_call_operand.vmem [shape: f32[1,32], index: 8, kind: input, shape index: {}]   ;;  %s1454_s9 = inlined_call_operand.vmem [shape: bf16[32,128], index: 9, kind: input, shape index: {}]   ;;  %s1455_s10 = inlined_call_operand.vmem [shape: f32[1,128], index: 10, kind: input, shape index: {}]   ;;  %s1456_s11 = inlined_call_operand.vmem [shape: bf16[128,32], index: 11, kind: input, shape index: {}]   ;;  %s1457_s12 = inlined_call_operand.vmem [shape: f32[1,32], index: 12, kind: input, shape index: {}]   ;;  %s1458_s13 = inlined_call_operand.vmem [shape: f32[2,8,32], index: 13, kind: output, shape index: {}, may-alias: {0,13}]  }
   0x1 LB: > { %s1042_s26 = sadd.s32 4294967295, %s1196_s25   ;;  %p1046_p0 = scmp.ge.s32.totalorder %s1196_s25, 1  ;;  %s1196_s25 = sphi %s1283_s25, %s23_s25  }
   0x2   : > { %p386_p1 = scmp.lt.s32.totalorder %s1196_s25, 3 }
   0x4   : > { %p387_p2 = pnand %p1046_p0, %p386_p1 }
   0x5   : > { %p428_p3 = scmp.lt.s32.totalorder (!%p387_p2), %s1042_s26, 1  ;;  %s1199_s24 = smov (!%p387_p2), 88  }
   0x6   : > { %390 = sbr.rel (%p387_p2) target bundleno = 2344 (0x928), region = 72  ;;  %s1200_s28 = smov (!%p387_p2), 64  }
   0x7   : > { %s1201_s29 = smov (!%p387_p2), 96   ;;  %s1203_s14 = smov (!%p387_p2), 80  }
   0x8   : > { %s1204_s15 = smov (!%p387_p2), 120   ;;  %s1205_s16 = smov (!%p387_p2), 104  }
   0x9   : > { %s1206_s17 = smov (!%p387_p2), 112   ;;  %s1207_s18 = smov (!%p387_p2), 40  }
   0xa   : > { %s1208_s19 = smov (!%p387_p2), 48   ;;  %s1209_s20 = smov (!%p387_p2), 56  }
   0xb   : > { %s1460_s26 = smov (!%p428_p3, %s1042_s26), 1  ;;  %vm440_vm0 = vcmask 261120   ;;  %v1198_v2 = vmov 32.0   ;;  %v1120_v14 = vld [vmem:[%s1448_s3 + $0x8] sm:$0xff]  ;;  %v1119_v15 = vld [vmem:[%s1448_s3] sm:$0xff]  ;;  %vm558_vm5 = vcmask 1043456  }
   0xc   : > { %s1047_s27 = sshll.u32 %s1460_s26, 3  ;;  %1164 = vrcp.f32 %v1198_v2  ;;  %508 = vmatpush.bf16.msra.mxu0 %v1120_v14  ;;  %v1156_v25 = vld [vmem:[%s1446_s1] ss:$0 sm:$0xff]  ;;  %vm521_vm6 = vcmask 64512   ;;  %s1210_s21 = smov 16   ;;  %vm765_vm7 = vcmask 130048  }
   0xd   : > { %s431_s30 = scalar_lea.vmem %s1445_s0, %s1047_s27  ;;  %v1157_v28 = vld [vmem:[%s1447_s2] ss:$0 sm:$0xff]  ;;  %s1211_s22 = smov 8   ;;  %vm768_vm8 = vcmask 195584   ;;  %vm772_vm9 = vcmask 257024  }
   0xe   : > { %v1299_v0 = vld [vmem:[%s431_s30] sm:$0xff]  ;;  %s1202_s30 = smov 72   ;;  %s1212_s23 = smov 24  }
   0xf   : > { %v441_v1 = vsel %vm440_vm0, %v1299_v0, 0.0  ;;  %v1158_v32 = vld [vmem:[%s1449_s4] ss:$0 sm:$0xff] }
  0x10   : > { %442 = vadd.xlane.f32.xlu0 %v441_v1  ;;  %509 = vmatpush.bf16.msra.mxu0 %v1119_v15 }
  0x12   : > { %v1165_v3 = vpop.eup %1164 }
  0x13   : > { %v445_v4 = vmul.f32 32.0, %v1165_v3  ;;  %vm449_vm1 = vweird.f32 %v1165_v3 }
  0x15   : > { %v446_v5 = vsub.f32 1.0, %v445_v4 }
  0x17   : > { %v447_v6 = vmul.f32 %v1165_v3, %v446_v5 }
  0x19   : > { %v448_v7 = vadd.f32 %v1165_v3, %v447_v6 }
  0x1b   : > { %v1303_v8 = vsel %vm449_vm1, %v1165_v3, %v448_v7 }
  0x83   : > { %v443_v9 = vpop.xlane.xlu0 %442 }
  0x84   : > { %v451_v10 = vmul.f32 %v1303_v8, %v443_v9 }
  0x86   : > { %v452_v11 = vsub.f32 %v1299_v0, %v451_v10 }
  0x88   : > { %v453_v12 = vmul.f32 %v452_v11, %v452_v11 }
  0x8a   : > { %v454_v13 = vsel %vm440_vm0, %v453_v12, 0.0 }
  0x8b   : > { %455 = vadd.xlane.f32.xlu0 %v454_v13 }
  0xfe   : > { %v456_v16 = vpop.xlane.xlu0 %455 }
  0xff   : > { %v457_v17 = vmul.f32 %v456_v16, %v1303_v8 }
 0x101   : > { %v458_v18 = vadd.f32 1e-05, %v457_v17 }
 0x103   : > { %1166 = vrsqrt.f32 %v458_v18  ;;  %vm465_vm3 = vweird.f32 %v458_v18 }
 0x109   : > { %v1167_v19 = vpop.eup %1166 }
 0x10a   : > { %v460_v20 = vmul.f32 %v1167_v19, %v458_v18  ;;  %vm466_vm2 = vweird.f32 %v1167_v19 }
 0x10b   : > { %vm467_vm4 = vmor %vm465_vm3, %vm466_vm2 }
 0x10c   : > { %v461_v21 = vmul.f32 %v1167_v19, %v460_v20 }
 0x10e   : > { %v462_v22 = vmul.f32 0.5, %v461_v21 }
 0x110   : > { %v463_v23 = vsub.f32 1.5, %v462_v22 }
 0x112   : > { %v464_v24 = vmul.f32 %v1167_v19, %v463_v23 }
 0x114   : > { %v468_v26 = vsel %vm467_vm4, %v1167_v19, %v464_v24 }
 0x115   : > { %v469_v27 = vmul.f32 %v468_v26, %v452_v11 }
 0x117   : > { %v473_v29 = vmul.f32 %v1156_v25, %v469_v27 }
 0x119   : > { %v477_v30 = vadd.f32 %v1157_v28, %v473_v29 }
 0x11b   : > { %v478_v31 = vpack.c.bf16 %v477_v30, %v477_v30 }
 0x11d   : > { %1057 = vmatmul.msk.bf16.vlgmr.msra.gmra.mxu0 %vm440_vm0, %v478_v31 }
 0x19a   : > { %v511_v33 = vpop.f32.mrf.mxu0 }
 0x19b   : > { %v512_v34 = vadd.f32 %v1158_v32, %v511_v33 }
 0x19d   : > { %v515_v35 = vpack.c.bf16 %v512_v34, %v512_v34 }
 0x19f   : > { %v517_v36 = vunpack.c.l.b16 %v515_v35 }
 0x1a1   : > { %v1325_v37 = vpack.c.b16 %v517_v36, %v517_v36 }
 0x1a2   : > { %v513_v38 = vpop.f32.mrf.mxu0 }
 0x1a3   : > { %578 = vrot.lane.b32.xlu0 %v1325_v37, %s1199_s24  ;;  %553 = vrot.lane.b32.xlu2 %v1325_v37, %s1200_s28 }
 0x1a4   : > { %519 = vrot.lane.b32.xlu1 %v1325_v37, %s1201_s29 }
 0x1ab   : > { %692 = vrot.lane.b32.xlu0 %v1325_v37, %s1202_s30 }
 0x1b3   : > { %635 = vrot.lane.b32.xlu0 %v1325_v37, %s1203_s14 }
 0x1fd   : > { %v554_v39 = vpop.permute.xlu2 %553 }
 0x1fe   : > { %v560_v40 = vsel %vm558_vm5, %v554_v39, 0 }
 0x1ff   : > { %569 = vmatpush.bf16.msra.mxu2 %v560_v40 }
 0x215   : > { %v579_v41 = vpop.permute.xlu0 %578 }
 0x216   : > { %v520_v42 = vpop.permute.xlu1 %519  ;;  %v584_v43 = vsel %vm521_vm6, %v579_v41, 0 }
 0x217   : > { %v526_v44 = vsel %vm521_vm6, %v520_v42, 0  ;;  %593 = vmatpush.bf16.xpose.msrb.mxu2 %v584_v43 }
 0x218   : > { %535 = vmatpush.bf16.xpose.msra.mxu1 %v526_v44 }
 0x21d   : > { %v693_v45 = vpop.permute.xlu0 %692 }
 0x21e   : > { %v698_v46 = vsel %vm521_vm6, %v693_v45, 0 }
 0x21f   : > { %1058 = vmatmul.msk.bf16.vlgmr.msra.gmra.mxu1 %vm521_vm6, %v515_v35  ;;  %707 = vmatpush.bf16.xpose.msra.mxu3 %v698_v46 }
 0x225   : > { %v636_v47 = vpop.permute.xlu0 %635 }
 0x226   : > { %v641_v48 = vsel %vm521_vm6, %v636_v47, 0 }
 0x227   : > { %650 = vmatpush.bf16.xpose.msrb.mxu0 %v641_v48 }
 0x29c   : > { %v537_v49 = vpop.f32.mrf.mxu1 }
 0x29d   : > { %v541_v50 = vsel %vm521_vm6, %v537_v49, -inf }
 0x29e   : > { %542 = vmax.xlane.f32.xlu1 %v541_v50 }
 0x2a4   : > { %v539_v51 = vpop.f32.mrf.mxu1 }
 0x311   : > { %v543_v52 = vpop.xlane.xlu1 %542 }
 0x312   : > { %v544_v53 = vsub.f32 %v537_v49, %v543_v52 }
 0x314   : > { %v545_v54 = vmul.f32 1.442695, %v544_v53 }
 0x316   : > { %1168 = vpow2.f32 %v545_v54 }
 0x31c   : > { %v1169_v55 = vpop.eup %1168 }
 0x31d   : > { %v547_v56 = vsel %vm521_vm6, %v1169_v55, 0.0 }
 0x31e   : > { %548 = vadd.xlane.f32.xlu2 %v547_v56 }
 0x336   : > { %576 = vrot.lane.b32.xlu2 %v1325_v37, %s1204_s15 }
 0x33e   : > { %690 = vrot.lane.b32.xlu2 %v1325_v37, %s1205_s16 }
 0x346   : > { %633 = vrot.lane.b32.xlu2 %v1325_v37, %s1206_s17 }
 0x391   : > { %v549_v57 = vpop.xlane.xlu2 %548 }
 0x392   : > { %1170 = vrcp.f32 %v549_v57 }
 0x398   : > { %v1171_v58 = vpop.eup %1170 }
 0x399   : > { %v577_v59 = vpop.permute.xlu2 %576  ;;  %v551_v60 = vmul.f32 %v1171_v58, %v1169_v55 }
 0x39b   : > { %v552_v61 = vpack.c.bf16 %v551_v60, %v551_v60 }
 0x39d   : > { %1059 = vmatmul.msk.bf16.vlgmr.msra.gmra.mxu2 %vm521_vm6, %v552_v61  ;;  %v1122_v61 = vld [vmem:[%s1450_s5 + $0x8] sm:$0xff] }
 0x39e   : > { %804 = vmatpush.bf16.msra.mxu0 %v1122_v61 }
 0x3a1   : > { %v691_v62 = vpop.permute.xlu2 %690 }
 0x3a2   : > { %1064 = vmatmul.msk.bf16.vlgmr.msra.gmra.mxu3 %vm521_vm6, %v691_v62  ;;  %v1121_v62 = vld [vmem:[%s1450_s5] sm:$0xff] }
 0x3a3   : > { %805 = vmatpush.bf16.msra.mxu0 %v1121_v62 }
 0x3a9   : > { %v634_v63 = vpop.permute.xlu2 %633 }
 0x3aa   : > { %1062 = vmatmul.msk.bf16.vlgmr.msrb.gmra.mxu0 %vm521_vm6, %v634_v63 }
 0x3ad   : > { %1060 = vmatmul.msk.bf16.vlgmr.msrb.gmra.mxu2 %vm521_vm6, %v577_v59 }
 0x420   : > { %v1347_v1 = vpop.f32.mrf.mxu2 }
 0x425   : > { %v709_v2 = vpop.f32.mrf.mxu3 }
 0x426   : > { %v713_v3 = vsel %vm521_vm6, %v709_v2, -inf }
 0x427   : > { %714 = vmax.xlane.f32.xlu0 %v713_v3  ;;  %v652_v4 = vpop.f32.mrf.mxu0 }
 0x428   : > { %v573_v5 = vpop.f32.mrf.mxu2  ;;  %v656_v6 = vsel %vm521_vm6, %v652_v4, -inf }
 0x429   : > { %657 = vmax.xlane.f32.xlu2 %v656_v6 }
 0x42d   : > { %v711_v7 = vpop.f32.mrf.mxu3 }
 0x42f   : > { %v654_v9 = vpop.f32.mrf.mxu0 }
 0x430   : > { %v595_v10 = vpop.f32.mrf.mxu2 }
 0x431   : > { %v599_v11 = vsel %vm521_vm6, %v595_v10, -inf }
 0x432   : > { %600 = vmax.xlane.f32.xlu1 %v599_v11 }
 0x438   : > { %v597_v12 = vpop.f32.mrf.mxu2 }
 0x441   : > { %725 = vrot.lane.b32.xlu2 %v1325_v37, %s1207_s18  ;;  %s1382_s18 = scalar_lea.vmem %s1458_s13, %s1047_s27 }
 0x49a   : > { %v715_v23 = vpop.xlane.xlu0 %714 }
 0x49b   : > { %v716_v24 = vsub.f32 %v709_v2, %v715_v23  ;;  %v575_v2 = vpack.c.bf16 %v1347_v1, %v1347_v1 }
 0x49c   : > { %v658_v13 = vpop.xlane.xlu2 %657 }
 0x49d   : > { %v659_v14 = vsub.f32 %v652_v4, %v658_v13  ;;  %v717_v25 = vmul.f32 1.442695, %v716_v24 }
 0x49f   : > { %v660_v15 = vmul.f32 1.442695, %v659_v14 }
 0x4a1   : > { %1172 = vpow2.f32 %v660_v15 }
 0x4a4   : > { %v726_v36 = vpop.permute.xlu2 %725 }
 0x4a5   : > { %v601_v16 = vpop.xlane.xlu1 %600  ;;  %v731_v40 = vsel %vm558_vm5, %v726_v36, 0 }
 0x4a6   : > { %v602_v17 = vsub.f32 %v595_v10, %v601_v16  ;;  %v1159_v10 = vld [vmem:[%s1451_s6] ss:$0 sm:$0xff] }
 0x4a7   : > { %v1173_v18 = vpop.eup %1172 }
 0x4a8   : > { %v603_v19 = vmul.f32 1.442695, %v602_v17  ;;  %v662_v20 = vsel %vm521_vm6, %v1173_v18, 0.0 }
 0x4a9   : > { %663 = vadd.xlane.f32.xlu0 %v662_v20 }
 0x4aa   : > { %1174 = vpow2.f32 %v603_v19 }
 0x4ab   : > { %1176 = vpow2.f32 %v717_v25 }
 0x4b0   : > { %v1175_v21 = vpop.eup %1174 }
 0x4b1   : > { %v605_v22 = vsel %vm521_vm6, %v1175_v21, 0.0  ;;  %v1177_v26 = vpop.eup %1176 }
 0x4b2   : > { %606 = vadd.xlane.f32.xlu1 %v605_v22  ;;  %v719_v27 = vsel %vm521_vm6, %v1177_v26, 0.0 }
 0x4bd   : > { %668 = vrot.lane.b32.xlu0 %v1325_v37, %s1208_s19 }
 0x4cb   : > { %611 = vrot.lane.b32.xlu1 %v1325_v37, %s1209_s20 }
 0x4f5   : > { %720 = vadd.xlane.f32.xlu1 %v719_v27 }
 0x51c   : > { %v664_v28 = vpop.xlane.xlu0 %663 }
 0x51d   : > { %1178 = vrcp.f32 %v664_v28 }
 0x523   : > { %v1179_v29 = vpop.eup %1178 }
 0x524   : > { %v666_v30 = vmul.f32 %v1179_v29, %v1173_v18 }
 0x525   : > { %v607_v32 = vpop.xlane.xlu1 %606 }
 0x526   : > { %v667_v34 = vpack.c.bf16 %v666_v30, %v666_v30  ;;  %1180 = vrcp.f32 %v607_v32 }
 0x52c   : > { %v1181_v35 = vpop.eup %1180 }
 0x52d   : > { %v609_v37 = vmul.f32 %v1181_v35, %v1175_v21  ;;  %v1123_v21 = vld [vmem:[%s1454_s9] sm:$0xff] }
 0x52f   : > { %v669_v31 = vpop.permute.xlu0 %668  ;;  %v610_v41 = vpack.c.bf16 %v609_v37, %v609_v37  ;;  %v1132_v37 = vld [vmem:[%s1456_s11 + $0x38] sm:$0xff] }
 0x530   : > { %v674_v33 = vsel %vm558_vm5, %v669_v31, 0  ;;  %v1160_v31 = vld [vmem:[%s1452_s7] ss:$0 sm:$0xff]  ;;  %974 = vmatpush.bf16.msrb.mxu3 %v1132_v37 }
 0x531   : > { %683 = vmatpush.bf16.msrb.mxu1 %v674_v33 }
 0x534   : > { %1063 = vmatmul.msk.bf16.vlgmr.msrb.gmra.mxu1 %vm521_vm6, %v667_v34 }
 0x53d   : > { %v612_v38 = vpop.permute.xlu1 %611 }
 0x53e   : > { %v617_v39 = vsel %vm558_vm5, %v612_v38, 0  ;;  %v1131_v38 = vld [vmem:[%s1456_s11 + $0x30] sm:$0xff] }
 0x53f   : > { %626 = vmatpush.bf16.msra.mxu2 %v617_v39  ;;  %975 = vmatpush.bf16.msrb.mxu3 %v1131_v38  ;;  %v1130_v39 = vld [vmem:[%s1456_s11 + $0x28] sm:$0xff] }
 0x542   : > { %1061 = vmatmul.msk.bf16.vlgmr.msra.gmra.mxu2 %vm521_vm6, %v610_v41  ;;  %v1128_v41 = vld [vmem:[%s1456_s11 + $0x18] sm:$0xff] }
 0x543   : > { %740 = vmatpush.bf16.msrb.mxu2 %v731_v40  ;;  %976 = vmatpush.bf16.msrb.mxu3 %v1130_v39  ;;  %v1129_v40 = vld [vmem:[%s1456_s11 + $0x20] sm:$0xff] }
 0x547   : > { %977 = vmatpush.bf16.msrb.mxu3 %v1129_v40 }
 0x54b   : > { %978 = vmatpush.bf16.msrb.mxu3 %v1128_v41 }
 0x568   : > { %v721_v42 = vpop.xlane.xlu1 %720 }
 0x569   : > { %1182 = vrcp.f32 %v721_v42  ;;  %v1127_v42 = vld [vmem:[%s1456_s11 + $0x10] sm:$0xff] }
 0x56a   : > { %979 = vmatpush.bf16.msrb.mxu3 %v1127_v42 }
 0x56f   : > { %v1183_v43 = vpop.eup %1182 }
 0x570   : > { %v723_v44 = vmul.f32 %v1183_v43, %v1177_v26  ;;  %v1126_v43 = vld [vmem:[%s1456_s11 + $0x8] sm:$0xff] }
 0x571   : > { %980 = vmatpush.bf16.msrb.mxu3 %v1126_v43 }
 0x572   : > { %v724_v45 = vpack.c.bf16 %v723_v44, %v723_v44  ;;  %v1162_v44 = vld [vmem:[%s1455_s10] ss:$0 sm:$0xff] }
 0x574   : > { %1065 = vmatmul.msk.bf16.vlgmr.msrb.gmra.mxu2 %vm521_vm6, %v724_v45 }
 0x5b1   : > { %v685_v46 = vpop.f32.mrf.mxu1 }
 0x5b2   : > { %v689_v47 = vpack.c.bf16 %v685_v46, %v685_v46  ;;  %v1125_v46 = vld [vmem:[%s1456_s11] sm:$0xff] }
 0x5b3   : > { %981 = vmatpush.bf16.msrb.mxu3 %v1125_v46 }
 0x5b4   : > { %v753_v48 = vunpack.c.l.b16 %v689_v47 }
 0x5b6   : > { %v754_v49 = vpack.c.b16 %v753_v48, %v753_v48 }
 0x5b8   : > { %755 = vrot.lane.b32.xlu0 %v754_v49, %s1210_s21 }
 0x5b9   : > { %v687_v50 = vpop.f32.mrf.mxu1 }
 0x5c5   : > { %v628_v51 = vpop.f32.mrf.mxu2 }
 0x5c6   : > { %v632_v52 = vpack.c.bf16 %v628_v51, %v628_v51 }
 0x5c8   : > { %v748_v53 = vunpack.c.l.b16 %v632_v52 }
 0x5ca   : > { %v749_v54 = vpack.c.b16 %v748_v53, %v748_v53 }
 0x5cc   : > { %750 = vrot.lane.b32.xlu2 %v749_v54, %s1211_s22 }
 0x5cd   : > { %v630_v55 = vpop.f32.mrf.mxu2 }
 0x5f7   : > { %v742_v56 = vpop.f32.mrf.mxu2 }
 0x5f8   : > { %v746_v57 = vpack.c.bf16 %v742_v56, %v742_v56 }
 0x5fa   : > { %v758_v58 = vunpack.c.l.b16 %v746_v57 }
 0x5fc   : > { %v759_v59 = vpack.c.b16 %v758_v58, %v758_v58 }
 0x5fe   : > { %760 = vrot.lane.b32.xlu2 %v759_v59, %s1212_s23 }
 0x5ff   : > { %v744_v60 = vpop.f32.mrf.mxu2 }
 0x626   : > { %v751_v63 = vpop.permute.xlu2 %750 }
 0x627   : > { %v764_v4 = vsel %vm521_vm6, %v575_v2, %v751_v63 }
 0x62a   : > { %v756_v3 = vpop.permute.xlu0 %755 }
 0x62b   : > { %v767_v5 = vsel %vm765_vm7, %v764_v4, %v756_v3  ;;  %v1163_v3 = vld [vmem:[%s1457_s12] ss:$0 sm:$0xff] }
 0x658   : > { %v761_v6 = vpop.permute.xlu2 %760 }
 0x659   : > { %v770_v7 = vsel %vm768_vm8, %v767_v5, %v761_v6 }
 0x65a   : > { %773 = vst.msk [vmem:[#allocation2] sm:$0xf] %vm772_vm9, %v770_v7 }
 0x661   : > { %v774_v9 = vld [vmem:[#allocation2] sm:$0xf] }
 0x662   : > { %1074 = vmatmul.msk.bf16.vlgmr.msra.gmra.mxu0 %vm440_vm0, %v774_v9 }
 0x6df   : > { %v807_v11 = vpop.f32.mrf.mxu0 }
 0x6e0   : > { %v808_v12 = vadd.f32 %v1159_v10, %v807_v11 }
 0x6e2   : > { %v812_v1 = vadd.f32 %v808_v12, %v1299_v0  ;;  %v1124_v0 = vld [vmem:[%s1454_s9 + $0x8] sm:$0xff] }
 0x6e3   : > { %878 = vmatpush.bf16.msra.mxu1 %v1124_v0 }
 0x6e4   : > { %813 = vst.msk [vmem:[%s1382_s18] sm:$0xff] %vm440_vm0, %v812_v1 }
 0x6e7   : > { %v809_v13 = vpop.f32.mrf.mxu0  ;;  %879 = vmatpush.bf16.msra.mxu1 %v1123_v21 }
 0x6eb   : > { %v1388_v14 = vld [vmem:[%s1382_s18] sm:$0xff] }
 0x6ec   : > { %v819_v15 = vsel %vm440_vm0, %v1388_v14, 0.0 }
 0x6ed   : > { %820 = vadd.xlane.f32.xlu0 %v819_v15 }
 0x760   : > { %v821_v16 = vpop.xlane.xlu0 %820 }
 0x761   : > { %v822_v17 = vmul.f32 %v821_v16, %v1303_v8 }
 0x763   : > { %v823_v18 = vsub.f32 %v1388_v14, %v822_v17 }
 0x765   : > { %v824_v19 = vmul.f32 %v823_v18, %v823_v18 }
 0x767   : > { %v825_v20 = vsel %vm440_vm0, %v824_v19, 0.0 }
 0x768   : > { %826 = vadd.xlane.f32.xlu1 %v825_v20 }
 0x7db   : > { %v827_v22 = vpop.xlane.xlu1 %826 }
 0x7dc   : > { %v828_v23 = vmul.f32 %v827_v22, %v1303_v8  ;;  %v1161_v8 = vld [vmem:[%s1453_s8] ss:$0 sm:$0xff] }
 0x7de   : > { %v829_v24 = vadd.f32 1e-05, %v828_v23 }
 0x7e0   : > { %1184 = vrsqrt.f32 %v829_v24  ;;  %vm836_vm11 = vweird.f32 %v829_v24 }
 0x7e6   : > { %v1185_v25 = vpop.eup %1184 }
 0x7e7   : > { %v831_v26 = vmul.f32 %v1185_v25, %v829_v24  ;;  %vm837_vm10 = vweird.f32 %v1185_v25 }
 0x7e8   : > { %vm838_vm12 = vmor %vm836_vm11, %vm837_vm10 }
 0x7e9   : > { %v832_v27 = vmul.f32 %v1185_v25, %v831_v26 }
 0x7eb   : > { %v833_v28 = vmul.f32 0.5, %v832_v27 }
 0x7ed   : > { %v834_v29 = vsub.f32 1.5, %v833_v28 }
 0x7ef   : > { %v835_v30 = vmul.f32 %v1185_v25, %v834_v29 }
 0x7f1   : > { %v839_v32 = vsel %vm838_vm12, %v1185_v25, %v835_v30 }
 0x7f2   : > { %v840_v33 = vmul.f32 %v839_v32, %v823_v18 }
 0x7f4   : > { %v844_v34 = vmul.f32 %v1160_v31, %v840_v33 }
 0x7f6   : > { %v848_v35 = vadd.f32 %v1161_v8, %v844_v34 }
 0x7f8   : > { %v849_v36 = vpack.c.bf16 %v848_v35, %v848_v35 }
 0x7fa   : > { %1083 = vmatmul.msk.bf16.vlgmr.msra.gmra.mxu1 %vm440_vm0, %v849_v36 }
 0x877   : > { %v881_v45 = vpop.f32.mrf.mxu1 }
 0x878   : > { %v882_v47 = vadd.f32 %v1162_v44, %v881_v45 }
 0x87a   : > { %v1084_v48 = vmul.f32 -1.702, %v882_v47 }
 0x87c   : > { %v887_v49 = vmul.f32 1.442695, %v1084_v48 }
 0x87e   : > { %1186 = vpow2.f32 %v887_v49 }
 0x87f   : > { %v883_v50 = vpop.f32.mrf.mxu1 }
 0x884   : > { %v1187_v51 = vpop.eup %1186 }
 0x885   : > { %v889_v52 = vadd.f32 1.0, %v1187_v51 }
 0x887   : > { %1188 = vrcp.f32 %v889_v52  ;;  %v901_v56 = vand.u32 2147483648, %v889_v52  ;;  %v899_v58 = vand.u32 2147483647, %v889_v52  ;;  %vm895_vm14 = vweird.f32 %v889_v52 }
 0x889   : > { %v902_v60 = vor.u32 1.1754944e-38, %v901_v56  ;;  %vm900_vm1 = vcmp.eq.f32.partialorder %v899_v58, 8.507059e+37 }
 0x88d   : > { %v1189_v53 = vpop.eup %1188 }
 0x88e   : > { %v891_v54 = vmul.f32 %v1189_v53, %v889_v52  ;;  %vm896_vm13 = vweird.f32 %v1189_v53 }
 0x88f   : > { %vm897_vm15 = vmor %vm895_vm14, %vm896_vm13 }
 0x890   : > { %v892_v55 = vsub.f32 1.0, %v891_v54 }
 0x892   : > { %v893_v57 = vmul.f32 %v1189_v53, %v892_v55 }
 0x894   : > { %v894_v59 = vadd.f32 %v1189_v53, %v893_v57 }
 0x896   : > { %v898_v61 = vsel %vm897_vm15, %v1189_v53, %v894_v59 }
 0x897   : > { %v903_v62 = vsel %vm900_vm1, %v902_v60, %v898_v61 }
 0x898   : > { %v905_v63 = vmul.f32 %v903_v62, %v882_v47 }
 0x89a   : > { %v906_v2 = vpack.c.bf16 %v905_v63, %v905_v63 }
 0x89c   : > { %982 = vmatmul.bf16.vlgmr.msrb.gmra.mxu3 %v906_v2 }
 0x91f   : > { %v983_v4 = vpop.f32.mrf.mxu3 }
 0x920   : > { %v984_v5 = vadd.f32 %v1163_v3, %v983_v4 }
 0x922   : > { %v987_v6 = vadd.f32 %v984_v5, %v1388_v14 }
 0x924   : > { %988 = vst.msk [vmem:[%s1382_s18] sm:$0xff] %vm440_vm0, %v987_v6 }
 0x927   : > { %v985_v7 = vpop.f32.mrf.mxu3 }
 0x928 PF: > { %s23_s25 = sadd.s32 1, %s1196_s25  }
 0x929   : > { %p20_p4 = scmp.ge.s32.totalorder %s23_s25, 4  }
 0x92b   :  { %22 = sbr.rel (!%p20_p4) target bundleno = 1 (0x1), region = 102 }

</bundles_post_ra>
